<compile_context>
chip_gen: v7x
topology: tpu7x:2x2x1
jax: 0.10.0
libtpu: 0.0.40
codegen_flags: <defaults>
</compile_context>

<pallas_src>
import jax
import jax.numpy as jnp
from jax import lax
from jax.experimental import pallas as pl
from jax.experimental.pallas import tpu as pltpu


def _round_up(a, b):
    return ((a + b - 1) // b) * b


def _fold_kernel(d_model):
    """Output block (rt, 128); `fold` tokens per row, d_model lanes each."""

    def kernel(tok_ref, emb_ref, out_ref):
        # Per-lane class id: lane % d_model (d_model is a power of two here,
        # so the modulo lowers to a cheap AND on the constant iota).
        lane = lax.broadcasted_iota(jnp.int32, out_ref.shape, 1)
        lane_cls = (lane % d_model).astype(jnp.float32)
        # Replicate each token across its own d_model-lane slot using the MXU
        # (completely idle in this kernel): (rt, fold) @ (fold, 128) 0/1
        # matrix. Token ids < d_model <= 64 are exact in f32.
        tok_map = jnp.dot(tok_ref[...].astype(jnp.float32), emb_ref[...],
                          preferred_element_type=jnp.float32)
        # One compare + one bool->f32 select per element -> store/DMA bound.
        out_ref[...] = (lane_cls == tok_map).astype(jnp.float32)

    return kernel


def _wide_kernel(d_tile):
    """Output block (rt, d_tile); one token per row."""

    def kernel(tok_ref, out_ref):
        lane = lax.broadcasted_iota(jnp.int32, out_ref.shape, 1)
        tgt = tok_ref[...] - pl.program_id(1) * d_tile          # (rt, 1) int32
        out_ref[...] = (lane == tgt).astype(jnp.float32)        # 2 VPU ops/elem

    return kernel


def one_hot_encoder(x, d_model, *, block_bytes=4 * 1024 * 1024, d_tile=None):
    """x: (B, L, 1) integer token ids -> (B, L, d_model) float32 one-hot."""
    B, L, _ = x.shape
    n_rows = B * L
    tokens = x.reshape(n_rows).astype(jnp.int32)

    # --- lane layout ---------------------------------------------------------
    if d_model < 128 and 128 % d_model == 0:
        fold = 128 // d_model          # d_model is a power of two
        lane_w = 128
        n_d_tiles = 1
    else:
        fold = 1
        if d_tile is None:
            d_tile = d_model           # single D tile: contiguous per-row writes
        assert d_model % d_tile == 0
        n_d_tiles = d_model // d_tile
        lane_w = d_tile

    # --- token layout: only pad to a multiple of `fold` ----------------------
    n_block_rows = pl.cdiv(n_rows, fold)
    n_pad_tok = n_block_rows * fold - n_rows
    if n_pad_tok:
        # Token id 0 is always in range (n_tokens <= d_model), so padded slots
        # never bleed into real rows; the extra rows are sliced off below.
        tokens = jnp.pad(tokens, (0, n_pad_tok))
    tokens = tokens.reshape(n_block_rows, fold)

    # --- row tiling: ~block_bytes per output block, multiple of 8 ------------
    rt = max(8, (block_bytes // (lane_w * 4)) // 8 * 8)
    rt = min(rt, _round_up(n_block_rows, 8))               # don't exceed data
    if pl.cdiv(n_block_rows, rt) < 2:
        # Split into >=2 row blocks (keeps both v7x TensorCores busy) as long
        # as each block stays >= ~1 MiB.
        half = _round_up(pl.cdiv(n_block_rows, 2), 8)
        if half * lane_w * 4 >= (1 << 20):
            rt = half
    n_row_blocks = pl.cdiv(n_block_rows, rt)

    out_block_bytes = rt * lane_w * 4
    # Double-buffered output block + f32 temporaries (iota / token map / result)
    # -> budget ~8x a block, clamped to stay safe on v5e (16 MiB default scoped)
    # and v7x (64 MiB physical).
    vmem_limit = int(min(48 * 2**20, max(24 * 2**20, 8 * out_block_bytes)))

    cost = pl.CostEstimate(
        flops=n_block_rows * fold * d_model,                 # compares
        transcendentals=0,
        bytes_accessed=n_block_rows * fold * (d_model * 4 + 4),
    )
    compiler_params = pltpu.CompilerParams(
        dimension_semantics=("parallel", "parallel"),
        vmem_limit_bytes=vmem_limit,
    )

    if fold > 1:
        # (fold, 128) 0/1 slot-expansion matrix for the in-kernel MXU matmul.
        slot = jnp.arange(128, dtype=jnp.int32) // d_model
        emb = (slot[None, :] ==
               jnp.arange(fold, dtype=jnp.int32)[:, None]).astype(jnp.float32)
        out = pl.pallas_call(
            _fold_kernel(d_model),
            out_shape=jax.ShapeDtypeStruct((n_block_rows, lane_w), jnp.float32),
            grid_spec=pltpu.PrefetchScalarGridSpec(
                num_scalar_prefetch=0,
                grid=(n_row_blocks, 1),
                in_specs=[pl.BlockSpec((rt, fold), lambda i, j: (i, 0)),
                          pl.BlockSpec((fold, 128), lambda i, j: (0, 0))],
                out_specs=pl.BlockSpec((rt, lane_w), lambda i, j: (i, j)),
            ),
            compiler_params=compiler_params,
            cost_estimate=cost,
        )(tokens, emb)
        # Contiguous (free) reshape back to one token per row.
        out = out.reshape(n_block_rows * fold, d_model)
        if n_pad_tok:
            out = out[:n_rows]        # copies only when padding was added
    else:
        out = pl.pallas_call(
            _wide_kernel(d_tile),
            out_shape=jax.ShapeDtypeStruct((n_block_rows, d_model), jnp.float32),
            grid_spec=pltpu.PrefetchScalarGridSpec(
                num_scalar_prefetch=0,
                grid=(n_row_blocks, n_d_tiles),
                in_specs=[pl.BlockSpec((rt, 1), lambda i, j: (i, 0))],
                out_specs=pl.BlockSpec((rt, lane_w), lambda i, j: (i, j)),
            ),
            compiler_params=compiler_params,
            cost_estimate=cost,
        )(tokens)

    return out.reshape(B, L, d_model)


if __name__ == "__main__":
    # OneHotEncoder(n_tokens=16, d_model=32); no learnable parameters.
    key = jax.random.PRNGKey(0)

    # 1) Small-d_model (lane-folded, MXU-replicated) path.
    n_tokens, d_model = 16, 32
    batch, seq = 2, 8
    x = jax.random.randint(key, (batch, seq, 1), 0, n_tokens, dtype=jnp.int32)
    y = jax.block_until_ready(one_hot_encoder(x, d_model))
    ref = jax.nn.one_hot(jnp.squeeze(x, -1), d_model, dtype=jnp.float32)
    assert y.shape == (batch, seq, d_model) and y.dtype == jnp.float32
    assert bool(jnp.all(y == ref))

    # 2) Fold path with row count not divisible by fold (pad + slice branch).
    x1 = jax.random.randint(jax.random.PRNGKey(1), (batch, 5, 1), 0, n_tokens,
                            dtype=jnp.int32)
    y1 = jax.block_until_ready(one_hot_encoder(x1, d_model))
    assert bool(jnp.all(y1 == jax.nn.one_hot(jnp.squeeze(x1, -1), d_model,
                                             dtype=jnp.float32)))

    # 3) Wide path (d_model >= 128) with an explicit class-tiling override.
    d_model2, n_tokens2 = 256, 100
    x2 = jax.random.randint(jax.random.PRNGKey(2), (batch, seq, 1), 0,
                            n_tokens2, dtype=jnp.int32)
    y2 = jax.block_until_ready(one_hot_encoder(x2, d_model2, d_tile=128))
    assert bool(jnp.all(y2 == jax.nn.one_hot(jnp.squeeze(x2, -1), d_model2,
                                             dtype=jnp.float32)))

    # 4) Wide path with non-128-multiple d_model (masked tail stores).
    d_model3, n_tokens3 = 100, 100
    x3 = jax.random.randint(jax.random.PRNGKey(3), (batch, seq, 1), 0,
                            n_tokens3, dtype=jnp.int32)
    y3 = jax.block_until_ready(one_hot_encoder(x3, d_model3))
    assert bool(jnp.all(y3 == jax.nn.one_hot(jnp.squeeze(x3, -1), d_model3,
                                             dtype=jnp.float32)))

    print("KERNEL_OK")
</pallas_src>

<mosaic_0001>
module attributes {stable_mosaic.version = 11 : i64} {
  func.func @kernel(%arg0: i32, %arg1: i32, %arg2: memref<8x4xi32, #tpu.memory_space<vmem>>, %arg3: memref<4x128xf32, #tpu.memory_space<vmem>>, %arg4: memref<8x128xf32, #tpu.memory_space<vmem>>) attributes {dimension_semantics = [#tpu.dimension_semantics<parallel>, #tpu.dimension_semantics<parallel>], iteration_bounds = array<i64: 1, 1>, scalar_prefetch = 0 : i64, scratch_operands = 0 : i64, tpu.core_type = #tpu.core_type<tc>, window_params = [{transform_indices = @transform_0, window_bounds = array<i64: 8, 4>}, {pipeline_mode = #tpu.pipeline_mode<synchronous>, transform_indices = @transform_1, window_bounds = array<i64: 4, 128>}, {transform_indices = @transform_2, window_bounds = array<i64: 8, 128>}]} {
    %0 = tpu.iota {dimensions = array<i32: 1>} : vector<8x128xi32>
    %c32_i32 = arith.constant 32 : i32
    %c0_i32 = arith.constant 0 : i32
    %1 = arith.cmpi eq, %c32_i32, %c0_i32 : i32
    %c1_i32 = arith.constant 1 : i32
    %2 = arith.select %1, %c1_i32, %c32_i32 : i32
    %3 = vector.broadcast %2 : i32 to vector<8x128xi32>
    %4 = arith.remsi %0, %3 : vector<8x128xi32>
    %c0_i32_0 = arith.constant 0 : i32
    %5 = vector.broadcast %c0_i32_0 : i32 to vector<8x128xi32>
    %6 = arith.cmpi ne, %4, %5 : vector<8x128xi32>
    %c0_i32_1 = arith.constant 0 : i32
    %7 = vector.broadcast %c0_i32_1 : i32 to vector<8x128xi32>
    %8 = arith.cmpi slt, %4, %7 : vector<8x128xi32>
    %c0_i32_2 = arith.constant 0 : i32
    %9 = arith.cmpi slt, %2, %c0_i32_2 : i32
    %10 = vector.broadcast %9 : i1 to vector<8x128xi1>
    %11 = vector.broadcast %10 : vector<8x128xi1> to vector<8x128xi1>
    %12 = arith.xori %8, %11 : vector<8x128xi1>
    %13 = arith.andi %12, %6 : vector<8x128xi1>
    %14 = vector.broadcast %2 : i32 to vector<8x128xi32>
    %15 = arith.addi %4, %14 : vector<8x128xi32>
    %16 = arith.select %13, %15, %4 : vector<8x128xi1>, vector<8x128xi32>
    %17 = arith.sitofp %16 : vector<8x128xi32> to vector<8x128xf32>
    %c0 = arith.constant 0 : index
    %c0_3 = arith.constant 0 : index
    %18 = vector.load %arg2[%c0, %c0_3] : memref<8x4xi32, #tpu.memory_space<vmem>>, vector<8x4xi32>
    %19 = arith.sitofp %18 : vector<8x4xi32> to vector<8x4xf32>
    %c0_4 = arith.constant 0 : index
    %c0_5 = arith.constant 0 : index
    %20 = vector.load %arg3[%c0_4, %c0_5] : memref<4x128xf32, #tpu.memory_space<vmem>>, vector<4x128xf32>
    %cst = arith.constant dense<0.000000e+00> : vector<8x128xf32>
    %21 = tpu.matmul %19, %20, %cst {dimension_numbers = #tpu.dot_dimension_numbers<[1], [0], [0], [1], [0, 0, 1, 1], [], []>} : vector<8x4xf32>, vector<4x128xf32>, vector<8x128xf32> -> vector<8x128xf32>
    %22 = arith.cmpf oeq, %17, %21 : vector<8x128xf32>
    %23 = arith.extui %22 : vector<8x128xi1> to vector<8x128xi32>
    %24 = arith.sitofp %23 : vector<8x128xi32> to vector<8x128xf32>
    %c0_6 = arith.constant 0 : index
    %c0_7 = arith.constant 0 : index
    %25 = vector.load %arg4[%c0_6, %c0_7] : memref<8x128xf32, #tpu.memory_space<vmem>>, vector<8x128xf32>
    tpu.vector_store %arg4[%c0_6, %c0_7], %24 {strides = array<i32>} : memref<8x128xf32, #tpu.memory_space<vmem>>, vector<8x128xf32>,
    return
  }
  func.func @transform_0(%arg0: i32, %arg1: i32) -> (i32, i32) {
    %c0_i32 = arith.constant 0 : i32
    %c0_i32_0 = arith.constant 0 : i32
    return %arg0, %c0_i32 : i32, i32
  }
  func.func @transform_1(%arg0: i32, %arg1: i32) -> (i32, i32) {
    %c0_i32 = arith.constant 0 : i32
    %c0_i32_0 = arith.constant 0 : i32
    %c0_i32_1 = arith.constant 0 : i32
    return %c0_i32, %c0_i32_0 : i32, i32
  }
  func.func @transform_2(%arg0: i32, %arg1: i32) -> (i32, i32) {
    %c0_i32 = arith.constant 0 : i32
    return %arg0, %arg1 : i32, i32
  }
}

</mosaic_0001>

<bundles_post_ra>
// kernel: tpu_custom_call.1
= control target key start
LH: loop header
LB: loop body
LE: loop exit
PB: predicated region body
PF: predicated region fallthrough
CT: control target
= control target key end

     0   :  { %7 = vsyncpa [#allocation3], 0  ;;  %s309_s0 = inlined_call_operand.hbm [shape: s32[4,4], index: 0, kind: input, shape index: {}]   ;;  %s310_s1 = inlined_call_operand.hbm [shape: f32[4,128], index: 1, kind: input, shape index: {}]   ;;  %s311_s2 = inlined_call_operand.hbm [shape: f32[4,128], index: 2, kind: output, shape index: {}]  }
   0x1   :  { %8 = vsyncpa [#allocation6], 0 }
   0x2   :  { %9 = vsyncpa [#allocation4], 0 }
   0x3   :  { %14 = vsyncadd [#allocation3], 64  ;;  %s245_s9 = smov [#allocation2]   ;;  %s173_s13 = scalar_lea.hbm %s309_s0, 64 }
   0x4   :  { %s15_s10 = sshll.u32 %s245_s9, 4  ;;  %p174_p0 = scmp.ne.s32.totalorder %s309_s0, %s173_s13  ;;  %s16_s10 = int_to_ptr.vmem [resolvable:$true] %s15_s10 }
   0x5   :  { %p177_p1 = scmp.lt.u32.totalorder %s173_s13, %s309_s0 }
   0x7   :  { %p179_p2 = pnand %p177_p1, %p174_p0 }
   0x9   :  { %182 = shalt.err (!%p179_p2)
}
   0xa   :  { %s183_s18 = scalar_lea.vmem %s16_s10, 64  ;;  %s187_s19 = scalar_lea.vmem %s16_s10, 128 }
   0xb   :  { %p184_p3 = scmp.ne.s32.totalorder %s16_s10, %s183_s18  ;;  %p188_p4 = scmp.lt.s32.totalorder %s16_s10, %s16_s10 }
   0xc   :  { %p189_p5 = scmp.lt.s32.totalorder %s187_s19, %s183_s18 }
   0xe   :  { %p190_p6 = por %p189_p5, %p188_p4 }
  0x10   :  { %p191_p7 = pnand %p190_p6, %p184_p3 }
  0x12   :  { %194 = shalt.err (!%p191_p7)
}
  0x13   :  { %s246_s20 = smov 64   ;;  %s247_s21 = smov 4  }
  0x14   :  { %21 = dma.hbm_to_vmem [thread:$0]  %s309_s0, 64, %s16_s10, [#allocation3], %s246_s20, %s246_s20, %s247_s21  }
  0x15   :  { %s248_s24 = smov [#allocation5]   ;;  %s195_s28 = scalar_lea.hbm %s310_s1, 64 }
  0x16   :  { %s28_s25 = sshll.u32 %s248_s24, 4  ;;  %p196_p8 = scmp.ne.s32.totalorder %s310_s1, %s195_s28  ;;  %s29_s25 = int_to_ptr.vmem [resolvable:$true] %s28_s25 }
  0x17   :  { %p199_p9 = scmp.lt.u32.totalorder %s195_s28, %s310_s1 }
  0x19   :  { %p201_p10 = pnand %p199_p9, %p196_p8 }
  0x1b   :  { %204 = shalt.err (!%p201_p10)
}
  0x1c   :  { %s205_s5 = scalar_lea.vmem %s29_s25, 64  ;;  %p210_p12 = scmp.lt.s32.totalorder %s29_s25, %s29_s25 }
  0x1d   :  { %p206_p11 = scmp.ne.s32.totalorder %s29_s25, %s205_s5  ;;  %p211_p13 = scmp.lt.s32.totalorder %s205_s5, %s205_s5 }
  0x1f   :  { %p212_p0 = por %p211_p13, %p210_p12 }
  0x21   :  { %p213_p1 = pnand %p212_p0, %p206_p11 }
  0x23   :  { %216 = shalt.err (!%p213_p1)
}
  0x24   :  { %31 = dma.hbm_to_vmem [thread:$0]  %s310_s1, 64, %s29_s25, [#allocation6]  }
  0x25   :  { %239 = dma.done.wait [#allocation3], 128  }
  0x26   :  { %240 = vsyncadd [#allocation3], 4294967168 }
  0x27   :  { %241 = dma.done.wait [#allocation6], 64  }
  0x28   :  { %242 = vsyncadd [#allocation6], 4294967232  ;;  %v249_v0 = vmov 0.0   ;;  %vm250_vm0 = vmmov 0   ;;  %vm60_vm1 = vcmask 1043456   ;;  %v53_v2 = vld [vmem:[#allocation2] sm:$0xff]  ;;  %v38_v4 = vlaneseq }
  0x29   :  { %161 = vmatprep.subr.mxu0 %v249_v0  ;;  %163 = vmatprep.mubr.msk.f32.mxu0 %vm250_vm0, %v249_v0  ;;  %v55_v1 = vld [vmem:[#allocation5] sm:$0xf]  ;;  %vm56_vm2 = vcmask 31744   ;;  %v54_v3 = vcvt.s32.f32 %v53_v2 }
  0x2a   :  { %162 = vmatpush3.msk.msra.mxu0 %vm60_vm1, %v55_v1  ;;  %v39_v5 = vand.u32 127, %v38_v4 }
  0x2b   :  { %164 = vmatmul.mubr.msk.f32.vlgmr.msra.gmra.mrb[0].mxu0 %vm56_vm2, %v54_v3 }
  0x2c   :  { %v44_v6 = vand.u32 31, %v39_v5 }
  0x2e   :  { %v52_v7 = vcvt.s32.f32 %v44_v6 }
  0xfe   :  { %v130_v8 = vpop.f32.mrb[0].mxu0 }
  0xff   :  { %vm134_vm3 = vcmp.eq.f32.partialorder %v52_v7, %v130_v8  ;;  %v165_v9 = vpop.f32.mrb[1].mxu0 }
 0x100   :  { %v158_v10 = vsel %vm134_vm3, 1.0, %v249_v0 }
 0x101   :  { %137 = vst [vmem:[#allocation7] sm:$0xff] %v158_v10 }
 0x102   :  { %142 = vsyncadd [#allocation4], 64  ;;  %s251_s1 = smov [#allocation7]  }
 0x103   :  { %s143_s7 = sshll.u32 %s251_s1, 4  ;;  %s144_s7 = int_to_ptr.vmem [resolvable:$true] %s143_s7 }
 0x104   :  { %s217_s8 = scalar_lea.vmem %s144_s7, 64  ;;  %s221_s9 = scalar_lea.vmem %s144_s7, 128 }
 0x105   :  { %p218_p2 = scmp.ne.s32.totalorder %s144_s7, %s217_s8  ;;  %p222_p3 = scmp.lt.s32.totalorder %s144_s7, %s144_s7 }
 0x106   :  { %p223_p4 = scmp.lt.s32.totalorder %s221_s9, %s217_s8 }
 0x108   :  { %p224_p5 = por %p223_p4, %p222_p3 }
 0x10a   :  { %p225_p6 = pnand %p224_p5, %p218_p2 }
 0x10c   :  { %228 = shalt.err (!%p225_p6)
}
 0x10d   :  { %s229_s12 = scalar_lea.hbm %s311_s2, 64 }
 0x10e   :  { %p230_p7 = scmp.ne.s32.totalorder %s311_s2, %s229_s12  ;;  %p233_p8 = scmp.lt.u32.totalorder %s229_s12, %s311_s2 }
 0x110   :  { %p235_p9 = pnand %p233_p8, %p230_p7 }
 0x112   :  { %238 = shalt.err (!%p235_p9)
}
 0x113   :  { %149 = dma.vmem_to_hbm [thread:$0]  %s144_s7, 64, %s311_s2, [#allocation4], %s246_s20, %s246_s20, %s247_s21  }
 0x114   :  { %243 = dma.done.wait [#allocation4], 128  }
 0x115   :  { %244 = vsyncadd [#allocation4], 4294967168 }
 0x116   :  { %153 = vsyncpa [#allocation3], 1 }
 0x117   :  { %154 = vsyncpa [#allocation6], 1 }
 0x118   :  { %155 = vsyncpa [#allocation4], 1 }

</bundles_post_ra>
